<compile_context>
chip_gen: v7x
topology: tpu7x:2x2x1
jax: 0.10.0
libtpu: 0.0.40
codegen_flags: <defaults>
</compile_context>

<pallas_src>
import jax
import jax.numpy as jnp
from jax.experimental import pallas as pl
from jax.experimental.pallas import tpu as pltpu


def _round_up(x: int, m: int) -> int:
    return ((x + m - 1) // m) * m


def _make_hept_kernel(fast_matmul: bool):
    def kernel(q_ref, k_ref, o_ref):
        # q_ref: (TQ, D), k_ref: (TK, D), o_ref: (TQ, TK); bh dim is Squeezed().
        q = q_ref[...]
        k = k_ref[...]
        if fast_matmul:
            # Single-pass bf16 MXU matmul with f32 accumulation.
            qm = q.astype(jnp.bfloat16)
            km = k.astype(jnp.bfloat16)
            prec = None
        else:
            qm = q.astype(jnp.float32)
            km = k.astype(jnp.float32)
            prec = jax.lax.Precision.HIGHEST

        # Norms computed from the same (possibly rounded) values as the matmul
        # so the ||q||^2 - 2 q.k + ||k||^2 cancellation stays consistent.
        qf = qm.astype(jnp.float32)
        kf = km.astype(jnp.float32)
        qn = -0.5 * jnp.sum(qf * qf, axis=-1, keepdims=True)   # (TQ, 1)
        kn = -0.5 * jnp.sum(kf * kf, axis=-1)                  # (TK,)

        # q @ k.T on the MXU, contracting over D.
        s = jax.lax.dot_general(
            qm, km,
            dimension_numbers=(((1,), (1,)), ((), ())),
            preferred_element_type=jnp.float32,
            precision=prec,
        )  # (TQ, TK)

        # exponent = q.k - 0.5||q||^2 - 0.5||k||^2 == -0.5 * dist_sq  (<= 0).
        expo = s + qn + kn[None, :]
        # Clamp tiny positive values from cancellation so kernel <= 1.
        o_ref[...] = jnp.exp(jnp.minimum(expo, 0.0)).astype(o_ref.dtype)

    return kernel


def simplified_hept(
    query: jax.Array,
    key: jax.Array,
    *,
    out_dtype=jnp.float32,
    fast_matmul: bool = True,
) -> jax.Array:
    """query, key: (batch, n_heads, seq_len, dim) -> (batch, n_heads, seq_len, seq_len)."""
    b, h, L, D = query.shape
    assert key.shape == (b, h, L, D)
    bh = b * h

    # Keep the input dtype as-is (no wrapper upcast / padding / slicing).
    q = query.reshape(bh, L, D)
    k = key.reshape(bh, L, D)

    # Tile sizes: large, lane-dense output tiles; ragged edges handled by
    # Pallas masking (grid uses cdiv).  TQ multiple of 8 (sublane), TK multiple
    # of 128 (lane).  512x1024 f32 output tile = 2 MiB, double-buffered ~4 MiB.
    TQ = min(512, _round_up(L, 8))
    TK = min(1024, _round_up(L, 128))
    grid = (bh, pl.cdiv(L, TQ), pl.cdiv(L, TK))

    out = pl.pallas_call(
        _make_hept_kernel(fast_matmul),
        out_shape=jax.ShapeDtypeStruct((bh, L, L), out_dtype),
        grid_spec=pltpu.PrefetchScalarGridSpec(
            num_scalar_prefetch=0,
            grid=grid,
            in_specs=[
                pl.BlockSpec((pl.Squeezed(), TQ, D), lambda b_, i, j: (b_, i, 0)),
                pl.BlockSpec((pl.Squeezed(), TK, D), lambda b_, i, j: (b_, j, 0)),
            ],
            out_specs=pl.BlockSpec(
                (pl.Squeezed(), TQ, TK), lambda b_, i, j: (b_, i, j)
            ),
        ),
        compiler_params=pltpu.CompilerParams(
            dimension_semantics=("parallel", "parallel", "parallel"),
            # Explicit scoped-VMEM budget: comfortably holds the double-buffered
            # tiles on v5e (16 MiB default) while staying < v7x's 64 MiB physical.
            vmem_limit_bytes=32 * 1024 * 1024,
        ),
    )(q, k)

    return out.reshape(b, h, L, L)


if __name__ == "__main__":
    # Small shapes consistent with the module's __init__ signature.
    batch_size = 2
    n_heads = 4
    seq_len = 8
    dim_per_head = 16

    key0 = jax.random.PRNGKey(0)
    kq, kk = jax.random.split(key0)
    query = jax.random.normal(
        kq, (batch_size, n_heads, seq_len, dim_per_head), dtype=jnp.float32
    )
    key = jax.random.normal(
        kk, (batch_size, n_heads, seq_len, dim_per_head), dtype=jnp.float32
    )

    out = simplified_hept(query, key)   # fast_matmul=True (bf16 MXU), f32 out
    jax.block_until_ready(out)
    assert out.shape == (batch_size, n_heads, seq_len, seq_len)

    # 1) Tight structural check against a bf16-consistent reference (same
    #    rounding as the fast MXU path) -> validates tiling / indexing exactly.
    q_bf = query.astype(jnp.bfloat16).astype(jnp.float32)
    k_bf = key.astype(jnp.bfloat16).astype(jnp.float32)
    ref_bf = jnp.exp(
        -0.5 * jnp.sum((q_bf[..., :, None, :] - k_bf[..., None, :, :]) ** 2, axis=-1)
    )
    assert jnp.allclose(out, ref_bf, atol=2e-4, rtol=1e-3), (
        float(jnp.max(jnp.abs(out - ref_bf)))
    )

    # 2) Semantics check against the exact f32 reference (torch module), with
    #    tolerance for the bf16 matmul rounding of the fast path.
    ref = jnp.exp(
        -0.5 * jnp.sum((query[..., :, None, :] - key[..., None, :, :]) ** 2, axis=-1)
    )
    assert jnp.allclose(out, ref, atol=1e-2, rtol=1e-1), (
        float(jnp.max(jnp.abs(out - ref)))
    )

    print("KERNEL_OK")
</pallas_src>

<mosaic_0001>
module attributes {stable_mosaic.version = 11 : i64} {
  func.func @kernel(%arg0: i32, %arg1: i32, %arg2: i32, %arg3: memref<1x8x16xf32, #tpu.memory_space<vmem>>, %arg4: memref<1x128x16xf32, #tpu.memory_space<vmem>>, %arg5: memref<1x8x128xf32, #tpu.memory_space<vmem>>) attributes {dimension_semantics = [#tpu.dimension_semantics<parallel>, #tpu.dimension_semantics<parallel>, #tpu.dimension_semantics<parallel>], iteration_bounds = array<i64: 8, 1, 1>, scalar_prefetch = 0 : i64, scratch_operands = 0 : i64, tpu.core_type = #tpu.core_type<tc>, window_params = [{transform_indices = @transform_0, window_bounds = array<i64: 1, 8, 16>}, {transform_indices = @transform_1, window_bounds = array<i64: 1, 128, 16>}, {transform_indices = @transform_2, window_bounds = array<i64: 1, 8, 128>}]} {
    %c0 = arith.constant 0 : index
    %c0_0 = arith.constant 0 : index
    %c0_1 = arith.constant 0 : index
    %0 = vector.load %arg3[%c0, %c0_0, %c0_1] : memref<1x8x16xf32, #tpu.memory_space<vmem>>, vector<1x8x16xf32>
    %1 = vector.shape_cast %0 : vector<1x8x16xf32> to vector<8x16xf32>
    %c0_2 = arith.constant 0 : index
    %c0_3 = arith.constant 0 : index
    %c0_4 = arith.constant 0 : index
    %2 = vector.load %arg4[%c0_2, %c0_3, %c0_4] : memref<1x128x16xf32, #tpu.memory_space<vmem>>, vector<1x128x16xf32>
    %3 = vector.shape_cast %2 : vector<1x128x16xf32> to vector<128x16xf32>
    %4 = arith.truncf %1 : vector<8x16xf32> to vector<8x16xbf16>
    %5 = arith.truncf %3 : vector<128x16xf32> to vector<128x16xbf16>
    %6 = arith.extf %4 : vector<8x16xbf16> to vector<8x16xf32>
    %7 = arith.extf %5 : vector<128x16xbf16> to vector<128x16xf32>
    %8 = arith.mulf %6, %6 : vector<8x16xf32>
    %cst = arith.constant dense<0.000000e+00> : vector<8xf32>
    %9 = vector.multi_reduction <add>, %8, %cst [1] : vector<8x16xf32> to vector<8xf32>
    %10 = vector.shape_cast %9 : vector<8xf32> to vector<8x1xf32>
    %cst_5 = arith.constant -5.000000e-01 : f32
    %11 = vector.broadcast %cst_5 : f32 to vector<8x1xf32>
    %12 = arith.mulf %11, %10 : vector<8x1xf32>
    %13 = arith.mulf %7, %7 : vector<128x16xf32>
    %cst_6 = arith.constant dense<0.000000e+00> : vector<128xf32>
    %14 = vector.multi_reduction <add>, %13, %cst_6 [1] : vector<128x16xf32> to vector<128xf32>
    %cst_7 = arith.constant -5.000000e-01 : f32
    %15 = vector.broadcast %cst_7 : f32 to vector<128xf32>
    %16 = arith.mulf %15, %14 : vector<128xf32>
    %cst_8 = arith.constant dense<0.000000e+00> : vector<8x128xf32>
    %17 = tpu.matmul %4, %5, %cst_8 {dimension_numbers = #tpu.dot_dimension_numbers<[1], [1], [0], [0], [0, 0, 1, 0], [], []>} : vector<8x16xbf16>, vector<128x16xbf16>, vector<8x128xf32> -> vector<8x128xf32>
    %18 = vector.broadcast %12 : vector<8x1xf32> to vector<8x128xf32>
    %19 = arith.addf %17, %18 : vector<8x128xf32>
    %20 = vector.shape_cast %16 : vector<128xf32> to vector<1x128xf32>
    %21 = vector.broadcast %20 : vector<1x128xf32> to vector<8x128xf32>
    %22 = arith.addf %19, %21 : vector<8x128xf32>
    %cst_9 = arith.constant 0.000000e+00 : f32
    %23 = vector.broadcast %cst_9 : f32 to vector<8x128xf32>
    %24 = arith.minimumf %22, %23 : vector<8x128xf32>
    %25 = math.exp %24 : vector<8x128xf32>
    %c0_10 = arith.constant 0 : index
    %c0_11 = arith.constant 0 : index
    %c0_12 = arith.constant 0 : index
    %26 = vector.load %arg5[%c0_10, %c0_11, %c0_12] : memref<1x8x128xf32, #tpu.memory_space<vmem>>, vector<1x8x128xf32>
    %27 = vector.shape_cast %26 : vector<1x8x128xf32> to vector<8x128xf32>
    %28 = vector.shape_cast %25 : vector<8x128xf32> to vector<1x8x128xf32>
    tpu.vector_store %arg5[%c0_10, %c0_11, %c0_12], %28 {strides = array<i32>} : memref<1x8x128xf32, #tpu.memory_space<vmem>>, vector<1x8x128xf32>,
    return
  }
  func.func @transform_0(%arg0: i32, %arg1: i32, %arg2: i32) -> (i32, i32, i32) {
    %c0_i32 = arith.constant 0 : i32
    %c0_i32_0 = arith.constant 0 : i32
    return %arg0, %arg1, %c0_i32 : i32, i32, i32
  }
  func.func @transform_1(%arg0: i32, %arg1: i32, %arg2: i32) -> (i32, i32, i32) {
    %c0_i32 = arith.constant 0 : i32
    %c0_i32_0 = arith.constant 0 : i32
    return %arg0, %arg2, %c0_i32 : i32, i32, i32
  }
  func.func @transform_2(%arg0: i32, %arg1: i32, %arg2: i32) -> (i32, i32, i32) {
    %c0_i32 = arith.constant 0 : i32
    return %arg0, %arg1, %arg2 : i32, i32, i32
  }
}

</mosaic_0001>

<bundles_post_ra>
// kernel: tpu_custom_call.1
= control target key start
LH: loop header
LB: loop body
LE: loop exit
PB: predicated region body
PF: predicated region fallthrough
CT: control target
= control target key end

     0   :  { %7 = vsyncpa [#allocation3], 0  ;;  %s1263_s0 = inlined_call_operand.hbm [shape: f32[8,8,16], index: 0, kind: input, shape index: {}]   ;;  %s1264_s1 = inlined_call_operand.hbm [shape: f32[8,8,16], index: 1, kind: input, shape index: {}]   ;;  %s1265_s2 = inlined_call_operand.hbm [shape: f32[8,8,8], index: 2, kind: output, shape index: {}]  }
   0x1   :  { %9 = vsyncpa [#allocation3 + $0x1], 0 }
   0x2   :  { %10 = vsyncpa [#allocation6], 0 }
   0x3   :  { %12 = vsyncpa [#allocation6 + $0x1], 0 }
   0x4   :  { %13 = vsyncpa [#allocation4], 0 }
   0x5   :  { %15 = vsyncpa [#allocation4 + $0x1], 0  ;;  %s974_s9 = smov 0   ;;  %s976_s10 = smov 0  }
   0x6   :  { %s978_s11 = smov 0   ;;  %s980_s12 = smov 0  }
   0x7   :  { %s982_s13 = smov 0   ;;  %s984_s14 = smov 0  }
   0x8 LB: > { %s702_s15 = sadd.s32 4294967295, %s950_s14   ;;  %s703_s16 = sadd.s32 4294967294, %s950_s14   ;;  %s950_s14 = sphi %s984_s14, %s21_s14   ;;  %s946_s13 = sphi %s982_s13, %s1279_s13   ;;  %s942_s12 = sphi %s980_s12, %s1278_s12   ;;  %s938_s11 = sphi %s978_s11, %s1277_s11   ;;  %s934_s10 = sphi %s976_s10, %s1276_s10   ;;  %s930_s9 = sphi %s974_s9, %s1275_s9  }
   0x9   : > { %s40_s17 = sadd.s32 1, %s946_s13  ;;  %s49_s18 = sadd.s32 1, %s938_s11 }
   0xa   : > { %p42_p0 = scmp.ge.s32.totalorder %s40_s17, 8  ;;  %p56_p1 = scmp.ne.s32.totalorder %s938_s11, %s934_s10 }
   0xb   : > { %p57_p2 = scmp.eq.s32.totalorder %s950_s14, 0  ;;  %p62_p3 = scmp.ne.s32.totalorder %s934_s10, %s930_s9 }
   0xc   : > { %s1281_s17 = smov (%p42_p0, %s40_s17), 0  ;;  %p63_p5 = scmp.eq.s32.totalorder %s702_s15, 0 }
   0xd   : > { %p1015_p4 = por %p57_p2, %p56_p1  ;;  %s44_s20 = ssub.s32 %s946_s13, %s1281_s17 }
   0xe   : > { %p118_p6 = scmp.eq.s32.totalorder %s702_s15, 7  ;;  %p47_p7 = scmp.eq.s32.totalorder %s44_s20, 0 }
   0xf   : > { %p1021_p8 = por %p63_p5, %p62_p3  ;;  %p124_p10 = scmp.eq.s32.totalorder %s703_s16, 7 }
  0x10   : > { %p1025_p9 = por %p118_p6, %p56_p1  ;;  %p705_p12 = scmp.ge.s32.totalorder %s950_s14, 8 }
  0x11   : > { %s1269_s21 = scalar_select %p1021_p8, 1, 0 }
  0x12   : > { %s1270_s22 = scalar_select %p1025_p9, 1, 0 }
  0x13   : > { %s1030_s23 = scalar_select %p47_p7, %s938_s11, %s49_s18  }
  0x14   : > { %p1032_p11 = por %p124_p10, %p62_p3  ;;  %140 = sbr.rel (%p705_p12) target bundleno = 78 (0x4e), region = 16 }
  0x15   : > { %s1038_s25 = sand.u32 (!%p705_p12), 1, %s938_s11   ;;  %s707_s26 = sshll.u32 (!%p705_p12), %s946_s13, 7 }
  0x16   : > { %s1271_s24 = scalar_select %p1032_p11, 1, 0 }
  0x17   : > { %s706_s27 = sshll.u32 (!%p705_p12), %s1038_s25, 3  ;;  %s1047_s30 = scalar_lea.hbm (!%p705_p12), %s1263_s0, %s707_s26 }
  0x18   : > { %s148_s3 = scalar_lea.vmem (!%p705_p12), [#allocation2], %s706_s27  ;;  %s145_s5 = scalar_lea.sflag (!%p705_p12), [#allocation3], %s1038_s25 }
  0x19   : > { %s156_s4 = sshll.u32 (!%p705_p12), %s148_s3, 4  ;;  %s812_s6 = scalar_lea.hbm (!%p705_p12), %s1047_s30, 128  ;;  %s157_s4 = int_to_ptr.vmem [resolvable:$true] %s156_s4 }
  0x1a   : > { %p813_p13 = scmp.ne.s32.totalorder (!%p705_p12), %s1047_s30, %s812_s6  ;;  %s816_s15 = scalar_lea.hbm (!%p705_p12), %s1263_s0, 1024 }
  0x1b   : > { %p817_p2 = scmp.lt.u32.totalorder %s1047_s30, %s1263_s0  ;;  %p818_p3 = scmp.lt.u32.totalorder %s816_s15, %s812_s6 }
  0x1c   : > { %p814_p0 = pnand %p813_p13, %p1015_p4  ;;  %p820_p6 = scmp.lt.u32.totalorder %s812_s6, %s1047_s30 }
  0x1d   : > { %p819_p5 = por %p818_p3, %p817_p2 }
  0x1e   : > { %p815_p1 = pneg %p814_p0 }
  0x1f   : > { %p821_p7 = por %p820_p6, %p819_p5 }
  0x21   : > { %p822_p10 = pnand %p821_p7, %p815_p1 }
  0x23   : > { %825 = shalt.err (!%p822_p10)
}
  0x24   : > { %s826_s20 = scalar_lea.vmem %s157_s4, 128  ;;  %s952_s27 = smov [#allocation2]  }
  0x25   : > { %p827_p12 = scmp.ne.s32.totalorder %s157_s4, %s826_s20  ;;  %s830_s28 = sshll.u32 %s952_s27, 4  ;;  %s831_s28 = int_to_ptr.vmem [resolvable:$false] %s830_s28 }
  0x26   : > { %s832_s29 = scalar_lea.vmem %s831_s28, 256  ;;  %p833_p11 = scmp.lt.s32.totalorder %s157_s4, %s831_s28 }
  0x27   : > { %p828_p13 = pnand %p827_p12, %p1015_p4  ;;  %p834_p9 = scmp.lt.s32.totalorder %s832_s29, %s826_s20 }
  0x29   : > { %p829_p0 = pneg %p828_p13  ;;  %p835_p8 = por %p834_p9, %p833_p11 }
  0x2b   : > { %p836_p2 = pnand %p835_p8, %p829_p0 }
  0x2d   : > { %839 = shalt.err (!%p836_p2)
}
  0x2e   : > { %748 = dma.hbm_to_vmem [thread:$0]  (%p1015_p4), %s1047_s30, 128, %s157_s4, %s145_s5  }
  0x2f   : > { %162 = sbr.rel (!%p1015_p4) target bundleno = 78 (0x4e), region = 24  ;;  %s708_s3 = sshll.u32 (%p1015_p4), %s1038_s25, 7 }
  0x30   : > { %s164_s6 = scalar_lea.sflag (%p1015_p4), [#allocation6], %s1038_s25  ;;  %s167_s7 = scalar_lea.vmem (%p1015_p4), [#allocation5], %s708_s3 }
  0x36   : > { %173 = vsyncadd %s164_s6, 1920  ;;  %s1078_s16 = scalar_lea.hbm %s1264_s1, %s707_s26  ;;  %s179_s19 = sshll.u32 %s167_s7, 4  ;;  %s180_s19 = int_to_ptr.vmem [resolvable:$true] %s179_s19 }
  0x37   : > { %s840_s30 = scalar_lea.hbm %s1078_s16, 128  ;;  %s842_s18 = scalar_lea.hbm %s1264_s1, 1024 }
  0x38   : > { %p841_p4 = scmp.ne.s32.totalorder %s1078_s16, %s840_s30  ;;  %p843_p8 = scmp.lt.u32.totalorder %s1078_s16, %s1264_s1 }
  0x39   : > { %p844_p9 = scmp.lt.u32.totalorder %s842_s18, %s840_s30  ;;  %p846_p1 = scmp.lt.u32.totalorder %s840_s30, %s1078_s16 }
  0x3b   : > { %p845_p11 = por %p844_p9, %p843_p8 }
  0x3d   : > { %p847_p3 = por %p846_p1, %p845_p11 }
  0x3f   : > { %p848_p5 = pnand %p847_p3, %p841_p4 }
  0x41   : > { %851 = shalt.err (!%p848_p5)
}
  0x42   : > { %s852_s26 = scalar_lea.vmem %s180_s19, 128  ;;  %s953_s28 = smov [#allocation5]  }
  0x43   : > { %p853_p6 = scmp.ne.s32.totalorder %s180_s19, %s852_s26  ;;  %s854_s29 = sshll.u32 %s953_s28, 4  ;;  %s855_s29 = int_to_ptr.vmem [resolvable:$false] %s854_s29 }
  0x44   : > { %s856_s3 = scalar_lea.vmem %s855_s29, 4096  ;;  %p857_p7 = scmp.lt.s32.totalorder %s180_s19, %s855_s29 }
  0x45   : > { %p858_p10 = scmp.lt.s32.totalorder %s856_s3, %s852_s26 }
  0x47   : > { %p859_p12 = por %p858_p10, %p857_p7 }
  0x49   : > { %p860_p13 = pnand %p859_p12, %p853_p6 }
  0x4b   : > { %863 = shalt.err (!%p860_p13)
}
  0x4c   : > { %s954_s7 = smov 128   ;;  %s955_s8 = smov 8  }
  0x4d   : > { %185 = dma.hbm_to_vmem [thread:$0]  %s1078_s16, 128, %s180_s19, %s164_s6, %s954_s7, %s954_s7, %s955_s8  }
  0x4e PF: > { %p710_p0 = scmp.ge.s32.totalorder %s950_s14, 1  ;;  %p187_p2 = scmp.lt.s32.totalorder %s950_s14, 9 }
  0x50   : > { %p188_p4 = pnand %p710_p0, %p187_p2 }
  0x51   : > { %s1096_s15 = sand.u32 (!%p188_p4), 1, %s934_s10   ;;  %p1272_p8 = scmp.ne.s32.totalorder (!%p188_p4), %s1269_s21, 0 }
  0x52   : > { %191 = sbr.rel (%p188_p4) target bundleno = 405 (0x195), region = 28  ;;  %s711_s30 = sshll.u32 (!%p188_p4), %s1096_s15, 3 }
  0x53   : > { %s194_s4 = scalar_lea.sflag (!%p188_p4), [#allocation3], %s1096_s15  ;;  %s1102_s25 = scalar_lea.vmem (!%p188_p4), [#allocation2], %s711_s30 }
  0x59   : > { %917 = dma.done.wait (%p1272_p8), %s194_s4, 128  }
  0x5a   : > { %919 = vsyncadd (%p1272_p8), %s194_s4, 4294967168  ;;  %s712_s6 = sshll.u32 %s1096_s15, 7  ;;  %s203_s16 = scalar_lea.sflag [#allocation6], %s1096_s15 }
  0x5b   : > { %s1110_s19 = scalar_lea.vmem [#allocation5], %s712_s6 }
  0x5c   : > { %921 = dma.done.wait (%p1272_p8), %s203_s16, 2048  }
  0x5d   : > { %923 = vsyncadd (%p1272_p8), %s203_s16, 4294965248  ;;  %v956_v0 = vmov 0.0   ;;  %vm957_vm0 = vmmov 0   ;;  %v237_v1 = vld [vmem:[%s1110_s19] sm:$0xff]  ;;  %v238_v2 = vld [vmem:[%s1110_s19 + $0x8] sm:$0xff]  ;;  %vm280_vm1 = vcmask 130048  }
  0x5e   : > { %728 = vmatprep.subr.bf16.mxu0 %v956_v0  ;;  %744 = vmatprep.mubr.msk.bf16.mxu0 %vm957_vm0, %v956_v0  ;;  %v239_v3 = vld [vmem:[%s1110_s19 + $0x10] sm:$0xff]  ;;  %v254_v4 = vpack.c.bf16 %v238_v2, %v237_v1  ;;  %v240_v5 = vld [vmem:[%s1110_s19 + $0x18] sm:$0xff]  ;;  %v241_v8 = vld [vmem:[%s1110_s19 + $0x20] sm:$0xff]  ;;  %vm459_vm2 = vcmask 130112   ;;  %vm466_vm3 = vcmask 195712   ;;  %vm473_vm4 = vcmask 261312  }
  0x5f   : > { %v255_v7 = vpack.c.bf16 %v240_v5, %v239_v3  ;;  %v242_v9 = vld [vmem:[%s1110_s19 + $0x28] sm:$0xff]  ;;  %v243_v12 = vld [vmem:[%s1110_s19 + $0x30] sm:$0xff]  ;;  %v244_v13 = vld [vmem:[%s1110_s19 + $0x38] sm:$0xff]  ;;  %vm480_vm5 = vcmask 326912   ;;  %vm487_vm6 = vcmask 392512   ;;  %vm494_vm7 = vcmask 458112  }
  0x60   : > { %v369_v6 = vsel %vm280_vm1, %v254_v4, 0  ;;  %v263_v10 = vunpack.c.l.bf16 %v254_v4  ;;  %v264_v11 = vunpack.c.h.bf16 %v254_v4  ;;  %v256_v16 = vpack.c.bf16 %v242_v9, %v241_v8  ;;  %v245_v21 = vld [vmem:[%s1110_s19 + $0x40] sm:$0xff]  ;;  %v246_v22 = vld [vmem:[%s1110_s19 + $0x48] sm:$0xff]  ;;  %v247_v35 = vld [vmem:[%s1110_s19 + $0x50] sm:$0xff]  ;;  %s716_s21 = sshll.u32 %s942_s12, 7  ;;  %s231_s5 = scalar_lea.vmem [#allocation7], %s711_s30 }
  0x61   : > { %729 = vmatpush3.bf16.xpose.msra.mxu0 %v369_v6  ;;  %v265_v15 = vunpack.c.l.bf16 %v255_v7  ;;  %v257_v17 = vpack.c.bf16 %v244_v13, %v243_v12  ;;  %v266_v23 = vunpack.c.h.bf16 %v255_v7  ;;  %v372_v26 = vsel %vm280_vm1, %v255_v7, 0  ;;  %v248_v36 = vld [vmem:[%s1110_s19 + $0x58] sm:$0xff]  ;;  %v249_v45 = vld [vmem:[%s1110_s19 + $0x60] sm:$0xff]  ;;  %v250_v46 = vld [vmem:[%s1110_s19 + $0x68] sm:$0xff]  ;;  %s593_s18 = sshll.u32 %s231_s5, 4  ;;  %s1215_s26 = scalar_lea.hbm %s1265_s2, %s716_s21  ;;  %s1217_s18 = int_to_ptr.vmem [resolvable:$true] %s593_s18 }
  0x62   : > { %730 = vmatprep.subr.bf16.mxu0 %v956_v0  ;;  %v285_v14 = vmul.f32 %v263_v10, %v263_v10  ;;  %v286_v20 = vmul.f32 %v264_v11, %v264_v11  ;;  %v267_v24 = vunpack.c.l.bf16 %v256_v16  ;;  %v268_v25 = vunpack.c.h.bf16 %v256_v16  ;;  %v251_v55 = vld [vmem:[%s1110_s19 + $0x70] sm:$0xff]  ;;  %v252_v56 = vld [vmem:[%s1110_s19 + $0x78] sm:$0xff]  ;;  %s578_s28 = scalar_lea.sflag [#allocation4], %s1096_s15  ;;  %s864_s29 = scalar_lea.vmem %s1217_s18, 128 }
  0x63   : > { %v287_v19 = vmul.f32 %v265_v15, %v265_v15  ;;  %v269_v29 = vunpack.c.l.bf16 %v257_v17  ;;  %v288_v30 = vmul.f32 %v266_v23, %v266_v23  ;;  %v1134_v32 = vpack.c.bf16 %v246_v22, %v245_v21  ;;  %v236_v1 = vld [vmem:[%s1102_s25] sm:$0xff]  ;;  %p865_p9 = scmp.ne.s32.totalorder %s1217_s18, %s864_s29  ;;  %p1273_p11 = scmp.ne.s32.totalorder %s1270_s22, 0 }
  0x64   : > { %v301_v18 = vsel %vm280_vm1, %v285_v14, 0.0  ;;  %v304_v28 = vsel %vm280_vm1, %v286_v20, 0.0  ;;  %v289_v31 = vmul.f32 %v267_v24, %v267_v24  ;;  %v290_v33 = vmul.f32 %v268_v25, %v268_v25  ;;  %s958_s12 = smov [#allocation7]  }
  0x65   : > { %302 = vadd.xlane.f32.xlu0 %v301_v18  ;;  %v307_v27 = vsel %vm280_vm1, %v287_v19, 0.0  ;;  %v270_v34 = vunpack.c.h.bf16 %v257_v17  ;;  %v310_v37 = vsel %vm280_vm1, %v288_v30, 0.0  ;;  %v291_v39 = vmul.f32 %v269_v29, %v269_v29  ;;  %p866_p1 = pnand %p865_p9, %p1273_p11  ;;  %s868_s3 = sshll.u32 %s958_s12, 4  ;;  %s869_s3 = int_to_ptr.vmem [resolvable:$false] %s868_s3 }
  0x66   : > { %308 = vadd.xlane.f32.xlu1 %v307_v27  ;;  %v313_v38 = vsel %vm280_vm1, %v289_v31, 0.0  ;;  %v271_v40 = vunpack.c.l.bf16 %v1134_v32  ;;  %v259_v41 = vpack.c.bf16 %v248_v36, %v247_v35  ;;  %v316_v42 = vsel %vm280_vm1, %v290_v33, 0.0  ;;  %s870_s7 = scalar_lea.vmem %s869_s3, 256  ;;  %p871_p5 = scmp.lt.s32.totalorder %s1217_s18, %s869_s3 }
  0x67   : > { %v292_v43 = vmul.f32 %v270_v34, %v270_v34  ;;  %v272_v44 = vunpack.c.h.bf16 %v1134_v32  ;;  %v375_v47 = vsel %vm280_vm1, %v256_v16, 0  ;;  %v319_v48 = vsel %vm280_vm1, %v291_v39, 0.0  ;;  %p867_p3 = pneg %p866_p1  ;;  %p872_p6 = scmp.lt.s32.totalorder %s870_s7, %s864_s29 }
  0x68   : > { %v293_v49 = vmul.f32 %v271_v40, %v271_v40  ;;  %v273_v50 = vunpack.c.l.bf16 %v259_v41  ;;  %v260_v51 = vpack.c.bf16 %v250_v46, %v249_v45  ;;  %v274_v54 = vunpack.c.h.bf16 %v259_v41 }
  0x69   : > { %731 = vmatpush3.bf16.xpose.msra.mxu0 %v372_v26  ;;  %305 = vadd.xlane.f32.xlu0 %v304_v28  ;;  %v322_v52 = vsel %vm280_vm1, %v292_v43, 0.0  ;;  %v294_v53 = vmul.f32 %v272_v44, %v272_v44  ;;  %v261_v60 = vpack.c.bf16 %v252_v56, %v251_v55  ;;  %v378_v2 = vsel %vm280_vm1, %v257_v17, 0  ;;  %p873_p7 = por %p872_p6, %p871_p5 }
  0x6a   : > { %732 = vmatprep.subr.bf16.mxu0 %v956_v0  ;;  %311 = vadd.xlane.f32.xlu1 %v310_v37  ;;  %v325_v57 = vsel %vm280_vm1, %v293_v49, 0.0  ;;  %v295_v58 = vmul.f32 %v273_v50, %v273_v50  ;;  %v275_v59 = vunpack.c.l.bf16 %v260_v51  ;;  %v296_v62 = vmul.f32 %v274_v54, %v274_v54 }
  0x6b   : > { %v328_v61 = vsel %vm280_vm1, %v294_v53, 0.0  ;;  %v276_v63 = vunpack.c.h.bf16 %v260_v51  ;;  %v277_v5 = vunpack.c.l.bf16 %v261_v60  ;;  %v253_v6 = vpack.c.bf16 %v236_v1, %v236_v1  ;;  %p874_p10 = pnand %p873_p7, %p867_p3 }
  0x6c   : > { %v331_v3 = vsel %vm280_vm1, %v295_v58, 0.0  ;;  %v297_v4 = vmul.f32 %v275_v59, %v275_v59  ;;  %v334_v7 = vsel %vm280_vm1, %v296_v62, 0.0  ;;  %v278_v9 = vunpack.c.h.bf16 %v261_v60 }
  0x6d   : > { %314 = vadd.xlane.f32.xlu0 %v313_v38  ;;  %v298_v8 = vmul.f32 %v276_v63, %v276_v63  ;;  %v299_v11 = vmul.f32 %v277_v5, %v277_v5  ;;  %v262_v12 = vunpack.c.l.bf16 %v253_v6  ;;  %v381_v15 = vsel %vm280_vm1, %v1134_v32, 0 }
  0x6e   : > { %317 = vadd.xlane.f32.xlu1 %v316_v42  ;;  %v337_v10 = vsel %vm280_vm1, %v297_v4, 0.0  ;;  %v300_v14 = vmul.f32 %v278_v9, %v278_v9  ;;  %v384_v20 = vsel %vm280_vm1, %v259_v41, 0  ;;  %v387_v21 = vsel %vm280_vm1, %v260_v51, 0 }
  0x6f   : > { %v340_v13 = vsel %vm280_vm1, %v298_v8, 0.0  ;;  %v343_v16 = vsel %vm280_vm1, %v299_v11, 0.0  ;;  %v279_v17 = vmul.f32 %v262_v12, %v262_v12  ;;  %v390_v22 = vsel %vm280_vm1, %v261_v60, 0 }
  0x70   : > { %v346_v18 = vsel %vm280_vm1, %v300_v14, 0.0  ;;  %v448_v23 = vlaneseq  ;;  %vm501_vm8 = vcmask 523712   ;;  %vm508_vm9 = vcmask 589312  }
  0x71   : > { %733 = vmatpush3.bf16.xpose.msra.mxu0 %v375_v47  ;;  %320 = vadd.xlane.f32.xlu0 %v319_v48  ;;  %v281_v19 = vsel %vm280_vm1, %v279_v17, 0.0  ;;  %vm515_vm10 = vcmask 654912   ;;  %vm522_vm11 = vcmask 720512   ;;  %vm529_vm12 = vcmask 786112  }
  0x72   : > { %734 = vmatprep.subr.bf16.mxu0 %v956_v0  ;;  %323 = vadd.xlane.f32.xlu1 %v322_v52  ;;  %v1173_v24 = vand.u32 127, %v448_v23  ;;  %v1175_v26 = vshrl.u32 %v448_v23, 7  ;;  %vm536_vm13 = vcmask 851712   ;;  %vm543_vm14 = vcmask 917312  }
  0x73   : > { %vm550_vm15 = vcmask 982912   ;;  %vm557_vm0 = vcmask 1048512  }
  0x74   : > { %v454_v27 = vadd.s32 4294967288, %v1173_v24  ;;  %v461_v29 = vadd.s32 4294967280, %v1173_v24  ;;  %v468_v34 = vadd.s32 4294967272, %v1173_v24  ;;  %v475_v40 = vadd.s32 4294967264, %v1173_v24 }
  0x75   : > { %326 = vadd.xlane.f32.xlu0 %v325_v57  ;;  %v482_v46 = vadd.s32 4294967256, %v1173_v24  ;;  %v489_v52 = vadd.s32 4294967248, %v1173_v24  ;;  %v496_v58 = vadd.s32 4294967240, %v1173_v24  ;;  %v503_v1 = vadd.s32 4294967232, %v1173_v24 }
  0x76   : > { %329 = vadd.xlane.f32.xlu1 %v328_v61  ;;  %v457_v32 = vsub.s32 %v454_v27, %v1175_v26  ;;  %v464_v35 = vsub.s32 %v461_v29, %v1175_v26  ;;  %v471_v41 = vsub.s32 %v468_v34, %v1175_v26  ;;  %v478_v47 = vsub.s32 %v475_v40, %v1175_v26 }
  0x77   : > { %v485_v53 = vsub.s32 %v482_v46, %v1175_v26  ;;  %v492_v59 = vsub.s32 %v489_v52, %v1175_v26  ;;  %v506_v8 = vsub.s32 %v503_v1, %v1175_v26  ;;  %v531_v27 = vadd.s32 4294967200, %v1173_v24 }
  0x79   : > { %735 = vmatpush3.bf16.xpose.msra.mxu0 %v378_v2  ;;  %332 = vadd.xlane.f32.xlu0 %v331_v3  ;;  %v499_v2 = vsub.s32 %v496_v58, %v1175_v26 }
  0x7a   : > { %736 = vmatprep.subr.bf16.mxu0 %v956_v0  ;;  %335 = vadd.xlane.f32.xlu1 %v334_v7  ;;  %v510_v7 = vadd.s32 4294967224, %v1173_v24 }
  0x7c   : > { %v513_v14 = vsub.s32 %v510_v7, %v1175_v26 }
  0x7d   : > { %338 = vadd.xlane.f32.xlu0 %v337_v10 }
  0x7e   : > { %341 = vadd.xlane.f32.xlu1 %v340_v13  ;;  %v517_v13 = vadd.s32 4294967216, %v1173_v24 }
  0x81   : > { %737 = vmatpush3.bf16.xpose.msra.mxu0 %v381_v15  ;;  %344 = vadd.xlane.f32.xlu0 %v343_v16 }
  0x82   : > { %738 = vmatprep.subr.bf16.mxu0 %v956_v0  ;;  %347 = vadd.xlane.f32.xlu1 %v346_v18 }
  0x85   : > { %282 = vadd.xlane.f32.xlu0 %v281_v19  ;;  %v524_v19 = vadd.s32 4294967208, %v1173_v24 }
  0x89   : > { %739 = vmatpush3.bf16.xpose.msra.mxu0 %v384_v20  ;;  %v520_v20 = vsub.s32 %v517_v13, %v1175_v26 }
  0x8a   : > { %740 = vmatprep.subr.bf16.mxu0 %v956_v0 }
  0x91   : > { %741 = vmatpush3.bf16.xpose.msra.mxu0 %v387_v21 }
  0x92   : > { %742 = vmatprep.subr.bf16.mxu0 %v956_v0  ;;  %v452_v0 = vsub.s32 %v1173_v24, %v1175_v26 }
  0x99   : > { %743 = vmatpush3.bf16.xpose.msra.mxu0 %v390_v22 }
  0xa0   : > { %745 = vmatmul.mubr.msk.bf16.vlgmr.msra.gmra.mrb[0].mxu0 %vm280_vm1, %v253_v6 }
  0xf2   : > { %v303_v25 = vpop.xlane.xlu0 %302 }
  0xf3   : > { %v309_v28 = vpop.xlane.xlu1 %308  ;;  %v349_v31 = vmul.f32 -0.5, %v303_v25 }
  0xf4   : > { %v351_v36 = vmul.f32 -0.5, %v309_v28  ;;  %v527_v28 = vsub.s32 %v524_v19, %v1175_v26 }
  0xf5   : > { %v453_v38 = vrot.slane %v349_v31, %v452_v0 }
  0xf6   : > { %v306_v30 = vpop.xlane.xlu0 %305  ;;  %v465_v44 = vrot.slane %v351_v36, %v464_v35 }
  0xf7   : > { %v350_v33 = vmul.f32 -0.5, %v306_v30  ;;  %v312_v37 = vpop.xlane.xlu1 %311 }
  0xf8   : > { %v352_v42 = vmul.f32 -0.5, %v312_v37 }
  0xf9   : > { %v458_v39 = vrot.slane %v350_v33, %v457_v32  ;;  %v538_v32 = vadd.s32 4294967192, %v1173_v24  ;;  %v534_v33 = vsub.s32 %v531_v27, %v1175_v26 }
  0xfa   : > { %v315_v43 = vpop.xlane.xlu0 %314  ;;  %v472_v50 = vrot.slane %v352_v42, %v471_v41 }
  0xfb   : > { %v460_v45 = vsel %vm459_vm2, %v458_v39, %v453_v38  ;;  %v353_v48 = vmul.f32 -0.5, %v315_v43  ;;  %v318_v49 = vpop.xlane.xlu1 %317  ;;  %v545_v38 = vadd.s32 4294967184, %v1173_v24  ;;  %v541_v39 = vsub.s32 %v538_v32, %v1175_v26 }
  0xfc   : > { %v467_v51 = vsel %vm466_vm3, %v465_v44, %v460_v45  ;;  %v354_v54 = vmul.f32 -0.5, %v318_v49  ;;  %v552_v44 = vadd.s32 4294967176, %v1173_v24 }
  0xfd   : > { %v479_v56 = vrot.slane %v353_v48, %v478_v47  ;;  %v474_v57 = vsel %vm473_vm4, %v472_v50, %v467_v51  ;;  %v548_v45 = vsub.s32 %v545_v38, %v1175_v26 }
  0xfe   : > { %v321_v55 = vpop.xlane.xlu0 %320  ;;  %v486_v62 = vrot.slane %v354_v54, %v485_v53  ;;  %v555_v50 = vsub.s32 %v552_v44, %v1175_v26 }
  0xff   : > { %v355_v60 = vmul.f32 -0.5, %v321_v55  ;;  %v324_v61 = vpop.xlane.xlu1 %323  ;;  %v481_v63 = vsel %vm480_vm5, %v479_v56, %v474_v57 }
 0x100   : > { %v356_v3 = vmul.f32 -0.5, %v324_v61  ;;  %v488_v6 = vsel %vm487_vm6, %v486_v62, %v481_v63 }
 0x101   : > { %v493_v5 = vrot.slane %v355_v60, %v492_v59 }
 0x102   : > { %v327_v4 = vpop.xlane.xlu0 %326  ;;  %v500_v11 = vrot.slane %v356_v3, %v499_v2 }
 0x103   : > { %v357_v9 = vmul.f32 -0.5, %v327_v4  ;;  %v330_v10 = vpop.xlane.xlu1 %329  ;;  %v495_v12 = vsel %vm494_vm7, %v493_v5, %v488_v6 }
 0x104   : > { %v358_v15 = vmul.f32 -0.5, %v330_v10  ;;  %v502_v18 = vsel %vm501_vm8, %v500_v11, %v495_v12 }
 0x105   : > { %v507_v17 = vrot.slane %v357_v9, %v506_v8 }
 0x106   : > { %v333_v16 = vpop.xlane.xlu0 %332  ;;  %v514_v23 = vrot.slane %v358_v15, %v513_v14 }
 0x107   : > { %v359_v21 = vmul.f32 -0.5, %v333_v16  ;;  %v336_v22 = vpop.xlane.xlu1 %335  ;;  %v509_v25 = vsel %vm508_vm9, %v507_v17, %v502_v18 }
 0x108   : > { %v360_v29 = vmul.f32 -0.5, %v336_v22  ;;  %v516_v31 = vsel %vm515_vm10, %v514_v23, %v509_v25 }
 0x109   : > { %v521_v0 = vrot.slane %v359_v21, %v520_v20 }
 0x10a   : > { %v339_v30 = vpop.xlane.xlu0 %338  ;;  %v528_v36 = vrot.slane %v360_v29, %v527_v28 }
 0x10b   : > { %v361_v34 = vmul.f32 -0.5, %v339_v30  ;;  %v342_v35 = vpop.xlane.xlu1 %341  ;;  %v523_v37 = vsel %vm522_vm11, %v521_v0, %v516_v31 }
 0x10c   : > { %v362_v40 = vmul.f32 -0.5, %v342_v35  ;;  %v530_v43 = vsel %vm529_vm12, %v528_v36, %v523_v37 }
 0x10d   : > { %v535_v42 = vrot.slane %v361_v34, %v534_v33 }
 0x10e   : > { %v345_v41 = vpop.xlane.xlu0 %344  ;;  %v542_v48 = vrot.slane %v362_v40, %v541_v39 }
 0x10f   : > { %v363_v46 = vmul.f32 -0.5, %v345_v41  ;;  %v348_v47 = vpop.xlane.xlu1 %347  ;;  %v537_v49 = vsel %vm536_vm13, %v535_v42, %v530_v43 }
 0x110   : > { %v364_v51 = vmul.f32 -0.5, %v348_v47  ;;  %v544_v54 = vsel %vm543_vm14, %v542_v48, %v537_v49 }
 0x111   : > { %v549_v53 = vrot.slane %v363_v46, %v548_v45 }
 0x112   : > { %v283_v52 = vpop.xlane.xlu0 %282  ;;  %v556_v56 = vrot.slane %v364_v51, %v555_v50 }
 0x113   : > { %v284_v55 = vmul.f32 -0.5, %v283_v52  ;;  %v551_v57 = vsel %vm550_vm15, %v549_v53, %v544_v54 }
 0x114   : > { %v558_v60 = vsel %vm557_vm0, %v556_v56, %v551_v57 }
 0x173   : > { %v426_v24 = vpop.f32.mrb[0].mxu0 }
 0x174   : > { %v427_v58 = vadd.f32 %v426_v24, %v284_v55  ;;  %v746_v59 = vpop.f32.mrb[1].mxu0 }
 0x175   : > { %v429_v61 = vpop.f32.mrb[2].mxu0 }
 0x176   : > { %v572_v62 = vadd.f32 %v558_v60, %v427_v58  ;;  %v747_v26 = vpop.f32.mrb[3].mxu0 }
 0x178   : > { %v573_v63 = vmin.f32 %v572_v62, 0.0 }
 0x17a   : > { %v574_v1 = vmul.f32 1.442695, %v573_v63 }
 0x17c   : > { %810 = vpow2.f32 %v574_v1 }
 0x186   : > { %v811_v2 = vpop.eup %810 }
 0x187   : > { %576 = vst [vmem:[%s231_s5] sm:$0xff] %v811_v2 }
 0x188   : > { %877 = shalt.err (!%p874_p10)
}
 0x189   : > { %s878_s8 = scalar_lea.hbm %s1215_s26, 128  ;;  %s882_s4 = scalar_lea.hbm %s1265_s2, 1024 }
 0x18a   : > { %p879_p12 = scmp.ne.s32.totalorder %s1215_s26, %s878_s8  ;;  %p883_p2 = scmp.lt.u32.totalorder %s1215_s26, %s1265_s2 }
 0x18b   : > { %p884_p4 = scmp.lt.u32.totalorder %s882_s4, %s878_s8  ;;  %p886_p9 = scmp.lt.u32.totalorder %s878_s8, %s1215_s26 }
 0x18c   : > { %p880_p13 = pnand %p879_p12, %p1273_p11 }
 0x18d   : > { %p885_p8 = por %p884_p4, %p883_p2 }
 0x18e   : > { %p881_p0 = pneg %p880_p13 }
 0x18f   : > { %p887_p1 = por %p886_p9, %p885_p8 }
 0x191   : > { %p888_p3 = pnand %p887_p1, %p881_p0 }
 0x193   : > { %891 = shalt.err (!%p888_p3)
}
 0x194   : > { %751 = dma.vmem_to_hbm [thread:$0]  (%p1273_p11), %s1217_s18, 128, %s1215_s26, %s578_s28  }
 0x195 PF: > { %p757_p5 = scmp.ge.s32.totalorder %s950_s14, 2  ;;  %s605_s16 = sand.u32 1, %s930_s9  }
 0x196   : > { %p1274_p6 = scmp.ne.s32.totalorder %s1271_s24, 0  ;;  %s606_s19 = scalar_lea.sflag [#allocation4], %s605_s16 }
 0x198   : > { %p754_p7 = pnand %p757_p5, %p1274_p6 }
 0x19a   : > { %925 = dma.done.wait (!%p754_p7), %s606_s19, 128  }
 0x19b   : > { %927 = vsyncadd (!%p754_p7), %s606_s19, 4294967168  ;;  %s21_s14 = sadd.s32 1, %s950_s14   ;;  %s1275_s9 = smov %s934_s10 }
 0x19c   : > { %p18_p10 = scmp.ge.s32.totalorder %s21_s14, 10   ;;  %s1276_s10 = smov %s938_s11 }
 0x19d   : > { %s1277_s11 = smov %s1030_s23  ;;  %s1278_s12 = smov %s946_s13 }
 0x19e   : > { %s1279_s13 = smov %s1281_s17  ;;  %20 = sbr.rel (!%p18_p10) target bundleno = 8 (0x8), region = 86 }
 0x1a5   :  { %611 = vsyncpa [#allocation3], 1 }
 0x1a6   :  { %613 = vsyncpa [#allocation3 + $0x1], 1 }
 0x1a7   :  { %614 = vsyncpa [#allocation6], 1 }
 0x1a8   :  { %616 = vsyncpa [#allocation6 + $0x1], 1 }
 0x1a9   :  { %617 = vsyncpa [#allocation4], 1 }
 0x1aa   :  { %619 = vsyncpa [#allocation4 + $0x1], 1 }

</bundles_post_ra>
